<compile_context>
chip_gen: v7x
topology: tpu7x:2x2x1
jax: 0.10.0
libtpu: 0.0.40
codegen_flags: <defaults>
</compile_context>

<pallas_src>
import jax
import jax.numpy as jnp
from jax import lax
from jax.experimental import pallas as pl
from jax.experimental.pallas import tpu as pltpu

D = 30
INPUT_SIZE = D
HIDDEN_SIZES = [D, D]
OUTPUT_SIZE = 1


def _mlp_kernel(x_ref, w1_ref, b1_ref, w2_ref, b2_ref, w3_ref, b3_ref, ot_ref):
    # x_ref : (bc, D)  native row-major batch tile (one contiguous HBM DMA)
    # w1/w2 : (D, D)   PyTorch (out, in) orientation, VMEM-resident
    # b1/b2 : (D, 1)   column biases (lane-broadcast)
    # w3    : (D, 1)   final-layer weight as a column
    # b3    : (1, 1)
    # ot_ref: (1, bc)  lane-dense output slab (batch on lanes)
    bc = x_ref.shape[0]

    # Chunk the per-tile compute over the batch so vreg live ranges stay bounded
    # (important on v5e: 64 vregs, single vector-store slot) while the DMA tile
    # stays large.  bc is always a multiple of 128.
    chunk = 256 if bc % 256 == 0 else 128
    n_chunks = bc // chunk

    w1 = w1_ref[...]
    b1 = b1_ref[...]
    w2 = w2_ref[...]
    b2 = b2_ref[...]
    w3 = w3_ref[...]
    b3 = b3_ref[...]

    @pl.loop(0, n_chunks)
    def _(c):
        start = pl.multiple_of(c * chunk, chunk)
        xb = x_ref[pl.ds(start, chunk), :]                     # (chunk, D)

        # Layer 1: contract on the feature axis of the native-layout sub-slab:
        # (D, D) x (chunk, D)^T -> (D, chunk).  The transpose/contraction runs on
        # the MXU/XLU extended slots, which are idle while the kernel waits on DMA.
        h1 = lax.dot_general(w1, xb, (((1,), (1,)), ((), ())),
                             preferred_element_type=jnp.float32) + b1
        h1 = jnp.maximum(h1, 0.0)

        # Layer 2: (D, D) @ (D, chunk) on the MXU; bias + ReLU on the VPU.
        h2 = jnp.dot(w2, h1, preferred_element_type=jnp.float32) + b2
        h2 = jnp.maximum(h2, 0.0)

        # Layer 3 (30 -> 1): VPU multiply + cross-sublane (XLU) reduce instead of
        # an M=1 MXU matmul.  Result is already lane-dense: (1, chunk).
        out = jnp.sum(h2 * w3, axis=0, keepdims=True) + b3
        ot_ref[:, pl.ds(start, chunk)] = out.astype(ot_ref.dtype)


def deep_regression_forward(x, params, *, block_cols=8192):
    """x: (B, INPUT_SIZE) float32.  params: see init_params()."""
    B, d_in = x.shape
    assert d_in == INPUT_SIZE

    # Batch tile: multiple of 128 (lane-dense output blocks), clamped for VMEM,
    # and capped so the 1-D grid keeps >= 2 steps when the batch allows it
    # (lets v7x's second TensorCore take half of the "parallel" grid).
    bc = (max(128, min(int(block_cols), 16384)) // 128) * 128
    if B >= 256:
        bc = min(bc, pl.cdiv(pl.cdiv(B, 2), 128) * 128)
    grid = (pl.cdiv(B, bc),)

    w1, b1 = params["w1"], params["b1"]
    w2, b2 = params["w2"], params["b2"]
    w3, b3 = params["w3"], params["b3"]

    const = lambda i: (0, 0)  # weights/biases: resident in VMEM, DMA'd once

    # Advisory cost estimate: two (30x30) matmul layers + final reduce/bias/relu,
    # and the real kernel HBM traffic (x read + y write + one-time weights).
    flops = int(B) * (2 * D * D * 2 + 2 * D + 4 * D)
    bytes_accessed = 4 * (x.size + B + w1.size + b1.size + w2.size + b2.size
                          + w3.size + b3.size)

    out_t = pl.pallas_call(
        _mlp_kernel,
        out_shape=jax.ShapeDtypeStruct((1, B), jnp.float32),
        grid=grid,
        in_specs=[
            pl.BlockSpec((bc, D), lambda i: (i, 0)),   # x: native layout, streamed
            pl.BlockSpec((D, D), const),               # w1 (resident)
            pl.BlockSpec((D, 1), const),               # b1
            pl.BlockSpec((D, D), const),               # w2
            pl.BlockSpec((D, 1), const),               # b2
            pl.BlockSpec((D, 1), const),               # w3 column
            pl.BlockSpec((1, 1), const),               # b3
        ],
        out_specs=pl.BlockSpec((1, bc), lambda i: (0, i)),   # lane-dense output slab
        compiler_params=pltpu.CompilerParams(
            dimension_semantics=("parallel",),          # megacore sharding on v7x
            vmem_limit_bytes=32 * 1024 * 1024,          # raises v5e's 16 MiB default
        ),
        cost_estimate=pl.CostEstimate(
            flops=flops, transcendentals=0, bytes_accessed=bytes_accessed),
    )(x, w1, b1, w2, b2, w3, b3)

    # (1, B) -> (B, 1): contiguous reshape (bitcast-level layout plumbing).
    return out_t.reshape(B, 1)


def init_params(key):
    """Deterministic init matching the nn.Linear shapes of the PyTorch module.

    w1, w2 are stored in native PyTorch (out, in) orientation (used directly in the
    batch-on-lanes pipeline); biases are stored as (out, 1) columns; the final
    layer's (1, 30) weight is stored transposed as a (30, 1) column.
    """
    k1, k2, k3, k4, k5, k6 = jax.random.split(key, 6)

    def uniform_fan_in(k, shape, fan_in):
        bound = 1.0 / jnp.sqrt(jnp.float32(fan_in))
        return jax.random.uniform(k, shape, jnp.float32, -bound, bound)

    return {
        # Linear(INPUT_SIZE -> HIDDEN_SIZES[0])
        "w1": uniform_fan_in(k1, (HIDDEN_SIZES[0], INPUT_SIZE), INPUT_SIZE),
        "b1": uniform_fan_in(k2, (HIDDEN_SIZES[0], 1), INPUT_SIZE),
        # Linear(HIDDEN_SIZES[0] -> HIDDEN_SIZES[1])
        "w2": uniform_fan_in(k3, (HIDDEN_SIZES[1], HIDDEN_SIZES[0]), HIDDEN_SIZES[0]),
        "b2": uniform_fan_in(k4, (HIDDEN_SIZES[1], 1), HIDDEN_SIZES[0]),
        # Linear(HIDDEN_SIZES[1] -> OUTPUT_SIZE), stored as a (30, 1) column
        "w3": uniform_fan_in(k5, (HIDDEN_SIZES[1], OUTPUT_SIZE), HIDDEN_SIZES[1]),
        "b3": uniform_fan_in(k6, (1, OUTPUT_SIZE), HIDDEN_SIZES[1]),
    }


def reference_forward(x, params):
    """Pure-JAX reference reproducing the PyTorch module semantics."""
    h1 = jnp.maximum(x @ params["w1"].T + params["b1"].T, 0.0)
    h2 = jnp.maximum(h1 @ params["w2"].T + params["b2"].T, 0.0)
    return h2 @ params["w3"] + params["b3"]


if __name__ == "__main__":
    key = jax.random.PRNGKey(0)
    k_params, k_x = jax.random.split(key)

    params = init_params(k_params)
    # B chosen NOT to divide the batch tile: exercises the masked partial edge
    # block, a multi-step "parallel" grid, and multiple in-kernel compute chunks.
    batch = 2500
    x = jax.random.normal(k_x, (batch, INPUT_SIZE), jnp.float32)

    out = deep_regression_forward(x, params)
    out = jax.block_until_ready(out)

    ref = reference_forward(x, params)
    assert out.shape == (batch, OUTPUT_SIZE)
    assert jnp.allclose(out, ref, atol=1e-5, rtol=1e-5), "mismatch vs reference"

    print("KERNEL_OK")
</pallas_src>

<mosaic_0001>
module attributes {stable_mosaic.version = 11 : i64} {
  func.func @_mlp_kernel(%arg0: i32, %arg1: memref<1280x30xf32, #tpu.memory_space<vmem>>, %arg2: memref<30x30xf32, #tpu.memory_space<vmem>>, %arg3: memref<30x1xf32, #tpu.memory_space<vmem>>, %arg4: memref<30x30xf32, #tpu.memory_space<vmem>>, %arg5: memref<30x1xf32, #tpu.memory_space<vmem>>, %arg6: memref<30x1xf32, #tpu.memory_space<vmem>>, %arg7: memref<1x1xf32, #tpu.memory_space<vmem>>, %arg8: memref<1x1280xf32, #tpu.memory_space<vmem>>) attributes {dimension_semantics = [#tpu.dimension_semantics<parallel>], iteration_bounds = array<i64: 2>, scalar_prefetch = 0 : i64, scratch_operands = 0 : i64, tpu.core_type = #tpu.core_type<tc>, window_params = [{transform_indices = @transform_0, window_bounds = array<i64: 1280, 30>}, {pipeline_mode = #tpu.pipeline_mode<synchronous>, transform_indices = @transform_1, window_bounds = array<i64: 30, 30>}, {pipeline_mode = #tpu.pipeline_mode<synchronous>, transform_indices = @transform_2, window_bounds = array<i64: 30, 1>}, {pipeline_mode = #tpu.pipeline_mode<synchronous>, transform_indices = @transform_3, window_bounds = array<i64: 30, 30>}, {pipeline_mode = #tpu.pipeline_mode<synchronous>, transform_indices = @transform_4, window_bounds = array<i64: 30, 1>}, {pipeline_mode = #tpu.pipeline_mode<synchronous>, transform_indices = @transform_5, window_bounds = array<i64: 30, 1>}, {pipeline_mode = #tpu.pipeline_mode<synchronous>, transform_indices = @transform_6, window_bounds = array<i64: 1, 1>}, {transform_indices = @transform_7, window_bounds = array<i64: 1, 1280>}]} {
    %c0 = arith.constant 0 : index
    %c0_0 = arith.constant 0 : index
    %0 = vector.load %arg2[%c0, %c0_0] : memref<30x30xf32, #tpu.memory_space<vmem>>, vector<30x30xf32>
    %c0_1 = arith.constant 0 : index
    %c0_2 = arith.constant 0 : index
    %1 = vector.load %arg3[%c0_1, %c0_2] : memref<30x1xf32, #tpu.memory_space<vmem>>, vector<30x1xf32>
    %c0_3 = arith.constant 0 : index
    %c0_4 = arith.constant 0 : index
    %2 = vector.load %arg4[%c0_3, %c0_4] : memref<30x30xf32, #tpu.memory_space<vmem>>, vector<30x30xf32>
    %c0_5 = arith.constant 0 : index
    %c0_6 = arith.constant 0 : index
    %3 = vector.load %arg5[%c0_5, %c0_6] : memref<30x1xf32, #tpu.memory_space<vmem>>, vector<30x1xf32>
    %c0_7 = arith.constant 0 : index
    %c0_8 = arith.constant 0 : index
    %4 = vector.load %arg6[%c0_7, %c0_8] : memref<30x1xf32, #tpu.memory_space<vmem>>, vector<30x1xf32>
    %c0_9 = arith.constant 0 : index
    %c0_10 = arith.constant 0 : index
    %5 = vector.load %arg7[%c0_9, %c0_10] : memref<1x1xf32, #tpu.memory_space<vmem>>, vector<1x1xf32>
    %c0_i32 = arith.constant 0 : i32
    %c5_i32 = arith.constant 5 : i32
    %6 = arith.addi %c0_i32, %c5_i32 : i32
    %c1_i32 = arith.constant 1 : i32
    scf.for %arg9 = %c0_i32 to %6 step %c1_i32  : i32 {
      %c1_i32_12 = arith.constant 1 : i32
      %7 = arith.muli %arg9, %c1_i32_12 : i32
      %c0_i32_13 = arith.constant 0 : i32
      %8 = arith.addi %c0_i32_13, %7 : i32
      %c256_i32 = arith.constant 256 : i32
      %9 = arith.muli %8, %c256_i32 : i32
      %10 = tpu.assume_multiple %9, 256 : i32
      %11 = arith.index_cast %10 : i32 to index
      %c0_14 = arith.constant 0 : index
      %12 = vector.load %arg1[%11, %c0_14] : memref<1280x30xf32, #tpu.memory_space<vmem>>, vector<256x30xf32>
      %cst = arith.constant dense<0.000000e+00> : vector<30x256xf32>
      %13 = tpu.matmul %0, %12, %cst {dimension_numbers = #tpu.dot_dimension_numbers<[1], [1], [0], [0], [0, 0, 1, 0], [], []>} : vector<30x30xf32>, vector<256x30xf32>, vector<30x256xf32> -> vector<30x256xf32>
      %14 = vector.broadcast %1 : vector<30x1xf32> to vector<30x256xf32>
      %15 = arith.addf %13, %14 : vector<30x256xf32>
      %cst_15 = arith.constant 0.000000e+00 : f32
      %16 = vector.broadcast %cst_15 : f32 to vector<30x256xf32>
      %17 = arith.maximumf %15, %16 : vector<30x256xf32>
      %cst_16 = arith.constant dense<0.000000e+00> : vector<30x256xf32>
      %18 = tpu.matmul %2, %17, %cst_16 {dimension_numbers = #tpu.dot_dimension_numbers<[1], [0], [0], [1], [0, 0, 1, 1], [], []>} : vector<30x30xf32>, vector<30x256xf32>, vector<30x256xf32> -> vector<30x256xf32>
      %19 = vector.broadcast %3 : vector<30x1xf32> to vector<30x256xf32>
      %20 = arith.addf %18, %19 : vector<30x256xf32>
      %cst_17 = arith.constant 0.000000e+00 : f32
      %21 = vector.broadcast %cst_17 : f32 to vector<30x256xf32>
      %22 = arith.maximumf %20, %21 : vector<30x256xf32>
      %23 = vector.broadcast %4 : vector<30x1xf32> to vector<30x256xf32>
      %24 = arith.mulf %22, %23 : vector<30x256xf32>
      %cst_18 = arith.constant dense<0.000000e+00> : vector<256xf32>
      %25 = vector.multi_reduction <add>, %24, %cst_18 [0] : vector<30x256xf32> to vector<256xf32>
      %26 = vector.shape_cast %25 : vector<256xf32> to vector<1x256xf32>
      %27 = vector.broadcast %5 : vector<1x1xf32> to vector<1x256xf32>
      %28 = arith.addf %26, %27 : vector<1x256xf32>
      %c0_19 = arith.constant 0 : index
      %29 = arith.index_cast %10 : i32 to index
      %30 = vector.load %arg8[%c0_19, %29] : memref<1x1280xf32, #tpu.memory_space<vmem>>, vector<1x256xf32>
      tpu.vector_store %arg8[%c0_19, %29], %28 {strides = array<i32>} : memref<1x1280xf32, #tpu.memory_space<vmem>>, vector<1x256xf32>,
    }
    %c5_i32_11 = arith.constant 5 : i32
    return
  }
  func.func @transform_0(%arg0: i32) -> (i32, i32) {
    %c0_i32 = arith.constant 0 : i32
    %c0_i32_0 = arith.constant 0 : i32
    return %arg0, %c0_i32 : i32, i32
  }
  func.func @transform_1(%arg0: i32) -> (i32, i32) {
    %c0_i32 = arith.constant 0 : i32
    %c0_i32_0 = arith.constant 0 : i32
    %c0_i32_1 = arith.constant 0 : i32
    return %c0_i32, %c0_i32_0 : i32, i32
  }
  func.func @transform_2(%arg0: i32) -> (i32, i32) {
    %c0_i32 = arith.constant 0 : i32
    %c0_i32_0 = arith.constant 0 : i32
    %c0_i32_1 = arith.constant 0 : i32
    return %c0_i32, %c0_i32_0 : i32, i32
  }
  func.func @transform_3(%arg0: i32) -> (i32, i32) {
    %c0_i32 = arith.constant 0 : i32
    %c0_i32_0 = arith.constant 0 : i32
    %c0_i32_1 = arith.constant 0 : i32
    return %c0_i32, %c0_i32_0 : i32, i32
  }
  func.func @transform_4(%arg0: i32) -> (i32, i32) {
    %c0_i32 = arith.constant 0 : i32
    %c0_i32_0 = arith.constant 0 : i32
    %c0_i32_1 = arith.constant 0 : i32
    return %c0_i32, %c0_i32_0 : i32, i32
  }
  func.func @transform_5(%arg0: i32) -> (i32, i32) {
    %c0_i32 = arith.constant 0 : i32
    %c0_i32_0 = arith.constant 0 : i32
    %c0_i32_1 = arith.constant 0 : i32
    return %c0_i32, %c0_i32_0 : i32, i32
  }
  func.func @transform_6(%arg0: i32) -> (i32, i32) {
    %c0_i32 = arith.constant 0 : i32
    %c0_i32_0 = arith.constant 0 : i32
    %c0_i32_1 = arith.constant 0 : i32
    return %c0_i32, %c0_i32_0 : i32, i32
  }
  func.func @transform_7(%arg0: i32) -> (i32, i32) {
    %c0_i32 = arith.constant 0 : i32
    %c0_i32_0 = arith.constant 0 : i32
    return %c0_i32, %arg0 : i32, i32
  }
}

</mosaic_0001>

<bundles_post_ra>
// kernel: tpu_custom_call.1
= control target key start
LH: loop header
LB: loop body
LE: loop exit
PB: predicated region body
PF: predicated region fallthrough
CT: control target
= control target key end

     0   :  { %s1550_s0 = inlined_call_operand.vmem [shape: f32[2500,30], index: 0, kind: input, shape index: {}]   ;;  %s1551_s1 = inlined_call_operand.vmem [shape: f32[30,30], index: 1, kind: input, shape index: {}]   ;;  %s1552_s2 = inlined_call_operand.vmem [shape: f32[30,1], index: 2, kind: input, shape index: {}]   ;;  %s1553_s3 = inlined_call_operand.vmem [shape: f32[30,30], index: 3, kind: input, shape index: {}]   ;;  %s1554_s4 = inlined_call_operand.vmem [shape: f32[30,1], index: 4, kind: input, shape index: {}]   ;;  %s1555_s5 = inlined_call_operand.vmem [shape: f32[30,1], index: 5, kind: input, shape index: {}]   ;;  %s1556_s6 = inlined_call_operand.<no memory space> [shape: f32[1,1], index: 6, kind: input, shape index: {}]   ;;  %s1557_s7 = inlined_call_operand.hbm [shape: f32[1,2500], index: 7, kind: output, shape index: {}]  }
   0x1   :  { %v12_v0 = vstv %s1556_s6 }
   0x2   :  { %13 = vst [vmem:[#allocation2] sm:$0x1] %v12_v0 }
   0x3   :  { %14 = vsyncpa [#allocation4], 0 }
   0x4   :  { %16 = vsyncpa [#allocation4 + $0x1], 0  ;;  %s1216_s26 = smov 0   ;;  %s1218_s27 = smov 0  }
   0x5   :  { %s1220_s28 = smov 0   ;;  %s1222_s29 = smov 0  }
   0x6 LB: > { %s891_s6 = sadd.s32 4294967295, %s1162_s29   ;;  %s892_s30 = sadd.s32 4294967294, %s1162_s29   ;;  %s1162_s29 = sphi %s1222_s29, %s1565_s29   ;;  %s1158_s28 = sphi %s1220_s28, %s1564_s28   ;;  %s1154_s27 = sphi %s1218_s27, %s1563_s27   ;;  %s1150_s26 = sphi %s1216_s26, %s1562_s26  }
   0x7   : > { %s1239_s8 = sadd.s32 1, %s1162_s29   ;;  %s181_s9 = sadd.s32 1, %s1158_s28 }
   0x8   : > { %s178_s10 = ssub.s32 %s1162_s29, %s1239_s8  ;;  %p191_p0 = scmp.ne.s32.totalorder %s1158_s28, %s1154_s27 }
   0x9   : > { %p179_p1 = scmp.eq.s32.totalorder %s178_s10, 0  ;;  %p192_p2 = scmp.eq.s32.totalorder %s891_s6, 1 }
   0xa   : > { %p197_p3 = scmp.ne.s32.totalorder %s1154_s27, %s1150_s26  ;;  %p198_p4 = scmp.eq.s32.totalorder %s892_s30, 1 }
   0xb   : > { %s1249_s11 = scalar_select %p179_p1, %s1158_s28, %s181_s9  }
   0xc   : > { %p1251_p5 = por %p192_p2, %p191_p0  ;;  %p1255_p6 = por %p198_p4, %p197_p3 }
   0xd   : > { %p895_p7 = scmp.ge.s32.totalorder %s1162_s29, 1  ;;  %p251_p8 = scmp.lt.s32.totalorder %s1162_s29, 3 }
   0xf   : > { %p252_p9 = pnand %p895_p7, %p251_p8 }
  0x10   : > { %s284_s14 = sand.u32 (!%p252_p9), 1, %s1154_s27   ;;  %s1262_s15 = smul.u32 (!%p252_p9), 160, %s891_s6  ;;  %v1267_v1 = vld [vmem:[%s1551_s1] sm:$0xff] (!%p252_p9)  ;;  %v1272_v2 = vld [vmem:[%s1551_s1 + $0x8] sm:$0xff] (!%p252_p9)  ;;  %v1277_v3 = vld [vmem:[%s1551_s1 + $0x10] sm:$0xff] (!%p252_p9) }
  0x11   : > { %255 = sbr.rel (%p252_p9) target bundleno = 600 (0x258), region = 48  ;;  %v1286_v4 = vld [vmem:[%s1551_s1 + $0x18] sm:$0x3f] (!%p252_p9)  ;;  %v1291_v5 = vld [vmem:[%s1552_s2] sm:$0xff] (!%p252_p9)  ;;  %v1296_v6 = vld [vmem:[%s1552_s2 + $0x8] sm:$0xff] (!%p252_p9)  ;;  %s1378_s25 = smov (!%p252_p9), 0  }
  0x12   : > { %s1281_s22 = smul.u32 (!%p252_p9), 10, %s284_s14  ;;  %p292_p10 = scmp.lt.s32.totalorder (!%p252_p9), %s1262_s15, 312  ;;  %v1302_v7 = vld [vmem:[%s1552_s2 + $0x10] sm:$0xff] (!%p252_p9)  ;;  %v1307_v8 = vld [vmem:[%s1552_s2 + $0x18] sm:$0x3f] (!%p252_p9)  ;;  %v1312_v9 = vld [vmem:[%s1553_s3] sm:$0xff] (!%p252_p9) }
  0x13   : > { %v1317_v10 = vld [vmem:[%s1553_s3 + $0x8] sm:$0xff] (!%p252_p9)  ;;  %v1322_v11 = vld [vmem:[%s1553_s3 + $0x10] sm:$0xff] (!%p252_p9)  ;;  %v1327_v12 = vld [vmem:[%s1553_s3 + $0x18] sm:$0x3f] (!%p252_p9) }
  0x14   : > { %v1333_v13 = vld [vmem:[%s1554_s4] sm:$0xff] (!%p252_p9)  ;;  %v1338_v14 = vld [vmem:[%s1554_s4 + $0x8] sm:$0xff] (!%p252_p9)  ;;  %v1343_v15 = vld [vmem:[%s1554_s4 + $0x10] sm:$0xff] (!%p252_p9)  ;;  %s286_s24 = scalar_lea.vmem (!%p252_p9), [#allocation3], %s1281_s22 }
  0x15   : > { %v1348_v16 = vld [vmem:[%s1554_s4 + $0x18] sm:$0x3f] (!%p252_p9)  ;;  %v1353_v17 = vld [vmem:[%s1555_s5] sm:$0xff] (!%p252_p9)  ;;  %v1358_v18 = vld [vmem:[%s1555_s5 + $0x8] sm:$0xff] (!%p252_p9) }
  0x16   : > { %v1363_v19 = vld [vmem:[%s1555_s5 + $0x10] sm:$0xff] (!%p252_p9)  ;;  %v1368_v20 = vld [vmem:[%s1555_s5 + $0x18] sm:$0x3f] (!%p252_p9)  ;;  %v1370_v21 = vld [vmem:[#allocation2] sm:$0x1] (!%p252_p9) }
  0x18   : > { %s293_s9 = scalar_select %p292_p10, %s1262_s15, 312 }
  0x1a   : > { %s896_s10 = sshll.u32 %s293_s9, 3 }
  0x1b   : > { %s1375_s23 = scalar_lea.vmem %s1550_s0, %s896_s10 }
  0x1c LB: >> { %vm383_vm0 = vcmask 244736   ;;  %v1168_v22 = vmov 0   ;;  %s897_s9 = sshll.u32 %s1166_s25, 8  ;;  %v1169_v23 = vmov 0.0   ;;  %vm621_vm2 = vcmask 1045504   ;;  %s328_s25 = sadd.s32 1, %s1166_s25   ;;  %s1166_s25 = sphi %s1378_s25, %s328_s25  }
  0x1d   : >> { %976 = vmatprep.mubr.msk.f32.mxu0 %vm383_vm0, %v1267_v1  ;;  %1094 = vset.pattern.permute.xlu0 %v1168_v22  ;;  %s1390_s6 = scalar_lea.vmem %s1375_s23, %s897_s9  ;;  %vm1394_vm1 = vmpackc.low %vm383_vm0, %vm383_vm0  ;;  %vm1170_vm3 = vmmov 1   ;;  %s802_s30 = sshra.s32 %s897_s9, 7 }
  0x1e   : >> { %365 = vperm.xlu0 %1094, %v1291_v5   ;;  %1095 = vset.pattern.permute.xlu1 %v1168_v22  ;;  %v347_v24 = vld [vmem:[%s1390_s6 + $0x80] sm:$0xff]  ;;  %v348_v25 = vld [vmem:[%s1390_s6 + $0x88] sm:$0xff]  ;;  %v349_v29 = vld [vmem:[%s1390_s6 + $0x90] sm:$0xff]  ;;  %s804_s10 = scalar_lea.vmem %s286_s24, %s802_s30 [#allocation3]  ;;  %p325_p11 = scmp.ge.s32.totalorder %s328_s25, 5  }
  0x1f   : >> { %375 = vperm.xlu1 %1095, %v1302_v7   ;;  %v331_v26 = vld [vmem:[%s1390_s6] sm:$0xff]  ;;  %v984_v27 = vpack.c.bf16 %v348_v25, %v347_v24  ;;  %v332_v28 = vld [vmem:[%s1390_s6 + $0x8] sm:$0xff]  ;;  %v350_v30 = vld [vmem:[%s1390_s6 + $0x98] sm:$0xff]  ;;  %692 = vmatprep.mubr.f32.mxu1 %v1169_v23  ;;  %s1510_s18 = scalar_lea.hbm (%p325_p11), %s1557_s7, %s1262_s15  ;;  %s825_s19 = sshll.u32 (%p325_p11), %s286_s24, 4  ;;  %s826_s19 = int_to_ptr.vmem [resolvable:$true] %s825_s19 }
  0x20   : >> { %v987_v31 = vpack.c.bf16 %v332_v28, %v331_v26  ;;  %v990_v32 = vpack.c.bf16 %v350_v30, %v349_v29  ;;  %v333_v33 = vld [vmem:[%s1390_s6 + $0x10] sm:$0xff]  ;;  %v334_v34 = vld [vmem:[%s1390_s6 + $0x18] sm:$0xff]  ;;  %v351_v35 = vld [vmem:[%s1390_s6 + $0xa0] sm:$0xff]  ;;  %s811_s20 = scalar_lea.sflag (%p325_p11), [#allocation4], %s284_s14  ;;  %s1096_s21 = scalar_lea.vmem (%p325_p11), %s826_s19, 160 }
  0x21   : >> { %986 = vmatprep.subr.msk.bf16.mxu0 %vm1394_vm1, %v984_v27  ;;  %v352_v36 = vld [vmem:[%s1390_s6 + $0xa8] sm:$0xff]  ;;  %v993_v37 = vpack.c.bf16 %v334_v34, %v333_v33  ;;  %v335_v39 = vld [vmem:[%s1390_s6 + $0x20] sm:$0xff]  ;;  %v353_v41 = vld [vmem:[%s1390_s6 + $0xb0] sm:$0xff]  ;;  %p1097_p12 = scmp.ne.s32.totalorder (%p325_p11), %s826_s19, %s1096_s21  ;;  %s1172_s25 = smov (%p325_p11), [#allocation3]  }
  0x22   : >> { %370 = vperm.xlu0 %1094, %v1296_v6   ;;  %989 = vmatpush3.bf16.xpose.msk.msra.mxu0 %vm1394_vm1, %v987_v31  ;;  %v996_v38 = vpack.c.bf16 %v352_v36, %v351_v35  ;;  %v336_v40 = vld [vmem:[%s1390_s6 + $0x28] sm:$0xff]  ;;  %v354_v42 = vld [vmem:[%s1390_s6 + $0xb8] sm:$0xff]  ;;  %v337_v45 = vld [vmem:[%s1390_s6 + $0x30] sm:$0xff]  ;;  %s1100_s23 = sshll.u32 (%p325_p11), %s1172_s25, 4  ;;  %s1101_s23 = int_to_ptr.vmem [resolvable:$false] %s1100_s23 }
  0x23   : >> { %380 = vperm.xlu1 %1095, %v1307_v8   ;;  %992 = vmatprep.subr.msk.bf16.mxu0 %vm1394_vm1, %v990_v32  ;;  %v999_v43 = vpack.c.bf16 %v336_v40, %v335_v39  ;;  %v1002_v44 = vpack.c.bf16 %v354_v42, %v353_v41  ;;  %v338_v46 = vld [vmem:[%s1390_s6 + $0x38] sm:$0xff]  ;;  %v355_v47 = vld [vmem:[%s1390_s6 + $0xc0] sm:$0xff]  ;;  %v356_v48 = vld [vmem:[%s1390_s6 + $0xc8] sm:$0xff]  ;;  %p1098_p13 = pnand (%p325_p11), %p1097_p12, %p1251_p5  ;;  %s1102_s9 = scalar_lea.vmem (%p325_p11), %s1101_s23, 320 }
  0x24   : >> { %v1005_v49 = vpack.c.bf16 %v338_v46, %v337_v45  ;;  %v1008_v50 = vpack.c.bf16 %v356_v48, %v355_v47  ;;  %v339_v51 = vld [vmem:[%s1390_s6 + $0x40] sm:$0xff]  ;;  %v340_v52 = vld [vmem:[%s1390_s6 + $0x48] sm:$0xff]  ;;  %v357_v53 = vld [vmem:[%s1390_s6 + $0xd0] sm:$0xff]  ;;  %p1103_p1 = scmp.lt.s32.totalorder (%p325_p11), %s826_s19, %s1101_s23  ;;  %p1104_p2 = scmp.lt.s32.totalorder (%p325_p11), %s1102_s9, %s1096_s21 }
  0x25   : >> { %v358_v54 = vld [vmem:[%s1390_s6 + $0xd8] sm:$0xff]  ;;  %v1011_v55 = vpack.c.bf16 %v340_v52, %v339_v51  ;;  %v341_v57 = vld [vmem:[%s1390_s6 + $0x50] sm:$0xff]  ;;  %v359_v59 = vld [vmem:[%s1390_s6 + $0xe0] sm:$0xff]  ;;  %p1099_p0 = pneg (%p325_p11), %p1098_p13 }
  0x26   : >> { %591 = vperm.xlu0 %1094, %v1333_v13   ;;  %v1014_v56 = vpack.c.bf16 %v358_v54, %v357_v53  ;;  %v342_v58 = vld [vmem:[%s1390_s6 + $0x58] sm:$0xff]  ;;  %v360_v60 = vld [vmem:[%s1390_s6 + $0xe8] sm:$0xff]  ;;  %v343_v63 = vld [vmem:[%s1390_s6 + $0x60] sm:$0xff]  ;;  %p1105_p3 = por (%p325_p11), %p1104_p2, %p1103_p1 }
  0x27   : >> { %596 = vperm.xlu1 %1095, %v1338_v14   ;;  %v1017_v61 = vpack.c.bf16 %v342_v58, %v341_v57  ;;  %v1020_v62 = vpack.c.bf16 %v360_v60, %v359_v59  ;;  %v344_v0 = vld [vmem:[%s1390_s6 + $0x68] sm:$0xff]  ;;  %v361_v22 = vld [vmem:[%s1390_s6 + $0xf0] sm:$0xff]  ;;  %v362_v24 = vld [vmem:[%s1390_s6 + $0xf8] sm:$0xff] }
  0x28   : >> { %v1023_v25 = vpack.c.bf16 %v344_v0, %v343_v63  ;;  %v1026_v26 = vpack.c.bf16 %v362_v24, %v361_v22  ;;  %v345_v27 = vld [vmem:[%s1390_s6 + $0x70] sm:$0xff]  ;;  %v346_v28 = vld [vmem:[%s1390_s6 + $0x78] sm:$0xff]  ;;  %vm1037_vm4 = vmpackc.low %vm621_vm2, %vm1170_vm3  ;;  %p1106_p4 = pnand (%p325_p11), %p1105_p3, %p1099_p0 }
  0x29   : >> { %v1029_v29 = vpack.c.bf16 %v346_v28, %v345_v27 }
  0x2a   : >> { %601 = vperm.xlu0 %1094, %v1343_v15   ;;  %995 = vmatpush3.bf16.xpose.msk.msra.mxu0 %vm1394_vm1, %v993_v37 }
  0x2b   : >> { %606 = vperm.xlu1 %1095, %v1348_v16   ;;  %998 = vmatprep.subr.msk.bf16.mxu0 %vm1394_vm1, %v996_v38 }
  0x2e   : >> { %727 = vperm.xlu0 %1094, %v1353_v17  }
  0x2f   : >> { %732 = vperm.xlu1 %1095, %v1358_v18  }
  0x32   : >> { %737 = vperm.xlu0 %1094, %v1363_v19   ;;  %1001 = vmatpush3.bf16.xpose.msk.msra.mxu0 %vm1394_vm1, %v999_v43 }
  0x33   : >> { %742 = vperm.xlu1 %1095, %v1368_v20   ;;  %1004 = vmatprep.subr.msk.bf16.mxu0 %vm1394_vm1, %v1002_v44 }
  0x36   : >> { %775 = vperm.xlu0 %1094, %v1370_v21  }
  0x3a   : >> { %1007 = vmatpush3.bf16.xpose.msk.msra.mxu0 %vm1394_vm1, %v1005_v49 }
  0x3b   : >> { %1010 = vmatprep.subr.msk.bf16.mxu0 %vm1394_vm1, %v1008_v50 }
  0x42   : >> { %1013 = vmatpush3.bf16.xpose.msk.msra.mxu0 %vm1394_vm1, %v1011_v55 }
  0x43   : >> { %1016 = vmatprep.subr.msk.bf16.mxu0 %vm1394_vm1, %v1014_v56 }
  0x4a   : >> { %1019 = vmatpush3.bf16.xpose.msk.msra.mxu0 %vm1394_vm1, %v1017_v61 }
  0x4b   : >> { %1022 = vmatprep.subr.msk.bf16.mxu0 %vm1394_vm1, %v1020_v62 }
  0x52   : >> { %1025 = vmatpush3.bf16.xpose.msk.msra.mxu0 %vm1394_vm1, %v1023_v25 }
  0x53   : >> { %1028 = vmatprep.subr.msk.bf16.mxu0 %vm1394_vm1, %v1026_v26 }
  0x5a   : >> { %1031 = vmatpush3.bf16.xpose.msk.msra.mxu0 %vm1394_vm1, %v1029_v29 }
  0x61   : >> { %977 = vmatmul.mubr.msk.f32.vlgmr.msra.gmra.mrb[0].mxu0 %vm383_vm0, %v1267_v1 }
  0x62   : >> { %978 = vmatprep.mubr.msk.f32.mxu0 %vm383_vm0, %v1272_v2 }
  0x65   : >> { %979 = vmatmul.mubr.msk.f32.gmra.mrb[2].mxu0 %vm383_vm0, %v1272_v2 }
  0x66   : >> { %980 = vmatprep.mubr.msk.f32.mxu0 %vm383_vm0, %v1277_v3 }
  0x69   : >> { %981 = vmatmul.mubr.msk.f32.gmra.mrb[4].mxu0 %vm383_vm0, %v1277_v3 }
  0x6a   : >> { %982 = vmatprep.mubr.msk.f32.mxu0 %vm383_vm0, %v1286_v4 }
  0x6d   : >> { %983 = vmatmul.mubr.msk.f32.gmra.mrb[6].mxu0 %vm383_vm0, %v1286_v4 }
  0x9d   : >> { %v366_v30 = vpop.permute.xlu0 %365 }
  0x9e   : >> { %v376_v39 = vpop.permute.xlu1 %375 }
  0xa1   : >> { %v371_v34 = vpop.permute.xlu0 %370 }
  0xa2   : >> { %v381_v50 = vpop.permute.xlu1 %380 }
  0xa5   : >> { %v592_v62 = vpop.permute.xlu0 %591 }
  0xa6   : >> { %v597_v63 = vpop.permute.xlu1 %596 }
  0xa9   : >> { %v602_v0 = vpop.permute.xlu0 %601 }
  0xaa   : >> { %v607_v26 = vpop.permute.xlu1 %606 }
 0x134   : >> { %v558_v31 = vpop.f32.mrb[0].mxu0 }
 0x135   : >> { %v560_v32 = vpop.f32.mrb[1].mxu0  ;;  %v559_v33 = vadd.f32 %v558_v31, %v366_v30 }
 0x136   : >> { %v561_v35 = vadd.f32 %v560_v32, %v366_v30  ;;  %v728_v32 = vpop.permute.xlu0 %727 }
 0x137   : >> { %v581_v41 = vmax.f32 %v559_v33, 0.0 }
 0x138   : >> { %v564_v36 = vpop.f32.mrb[2].mxu0  ;;  %v582_v43 = vmax.f32 %v561_v35, 0.0 }
 0x139   : >> { %v565_v37 = vadd.f32 %v564_v36, %v371_v34  ;;  %v566_v38 = vpop.f32.mrb[3].mxu0 }
 0x13a   : >> { %v567_v40 = vadd.f32 %v566_v38, %v371_v34 }
 0x13b   : >> { %v583_v42 = vmax.f32 %v565_v37, 0.0 }
 0x13c   : >> { %v584_v44 = vmax.f32 %v567_v40, 0.0  ;;  %v570_v45 = vpop.f32.mrb[4].mxu0 }
 0x13d   : >> { %v572_v46 = vpop.f32.mrb[5].mxu0  ;;  %v1034_v47 = vpack.c.bf16 %v583_v42, %v581_v41  ;;  %v571_v49 = vadd.f32 %v570_v45, %v376_v39 }
 0x13e   : >> { %v1032_v48 = vpack.c.bf16 %v584_v44, %v582_v43  ;;  %v573_v51 = vadd.f32 %v572_v46, %v376_v39 }
 0x13f   : >> { %v585_v56 = vmax.f32 %v571_v49, 0.0 }
 0x140   : >> { %v576_v52 = vpop.f32.mrb[6].mxu0  ;;  %1033 = vmatprep.subr.bf16.mxu1 %v1032_v48  ;;  %v586_v58 = vmax.f32 %v573_v51, 0.0 }
 0x141   : >> { %v577_v53 = vadd.f32 %v576_v52, %v381_v50  ;;  %v578_v54 = vpop.f32.mrb[7].mxu0  ;;  %1035 = vmatpush1.bf16.msra.mxu1 %v1034_v47  ;;  %v738_v47 = vpop.permute.xlu0 %737 }
 0x142   : >> { %v579_v55 = vadd.f32 %v578_v54, %v381_v50 }
 0x143   : >> { %v587_v57 = vmax.f32 %v577_v53, 0.0 }
 0x144   : >> { %v588_v59 = vmax.f32 %v579_v55, 0.0 }
 0x145   : >> { %v1039_v60 = vpack.c.bf16 %v587_v57, %v585_v56 }
 0x146   : >> { %v1036_v61 = vpack.c.bf16 %v588_v59, %v586_v58 }
 0x148   : >> { %1038 = vmatprep.subr.msk.bf16.mxu1 %vm1037_vm4, %v1036_v61 }
 0x149   : >> { %1041 = vmatpush1.bf16.msk.msra.mxu1 %vm1037_vm4, %v1039_v60 }
 0x14c   : >> { %936 = vmatmul.mubr.msk.f32.vlgmr.msra.gmra.mrb[0].mxu1 %vm383_vm0, %v1312_v9 }
 0x14d   : >> { %698 = vmatprep.mubr.f32.mxu1 %v1169_v23 }
 0x150   : >> { %937 = vmatmul.mubr.msk.f32.gmra.mrb[2].mxu1 %vm383_vm0, %v1317_v10 }
 0x151   : >> { %704 = vmatprep.mubr.f32.mxu1 %v1169_v23 }
 0x154   : >> { %938 = vmatmul.mubr.msk.f32.gmra.mrb[4].mxu1 %vm383_vm0, %v1322_v11 }
 0x155   : >> { %710 = vmatprep.mubr.f32.mxu1 %v1169_v23  ;;  %v733_v23 = vpop.permute.xlu1 %732 }
 0x158   : >> { %939 = vmatmul.mubr.msk.f32.gmra.mrb[6].mxu1 %vm383_vm0, %v1327_v12 }
 0x159   : >> { %v743_v58 = vpop.permute.xlu1 %742 }
 0x21f   : >> { %v694_v22 = vpop.f32.mrb[0].mxu1 }
 0x220   : >> { %v695_v24 = vadd.f32 %v694_v22, %v592_v62  ;;  %v696_v25 = vpop.f32.mrb[1].mxu1 }
 0x221   : >> { %v697_v27 = vadd.f32 %v696_v25, %v592_v62 }
 0x222   : >> { %v717_v29 = vmax.f32 %v695_v24, 0.0 }
 0x223   : >> { %v700_v28 = vpop.f32.mrb[2].mxu1  ;;  %v718_v33 = vmax.f32 %v697_v27, 0.0 }
 0x224   : >> { %v701_v30 = vadd.f32 %v700_v28, %v597_v63  ;;  %v702_v31 = vpop.f32.mrb[3].mxu1  ;;  %v745_v38 = vmul.f32 %v728_v32, %v717_v29 }
 0x225   : >> { %v703_v34 = vadd.f32 %v702_v31, %v597_v63  ;;  %v746_v42 = vmul.f32 %v728_v32, %v718_v33  ;;  %v1171_v32 = vmov 1966171168  }
 0x226   : >> { %v719_v35 = vmax.f32 %v701_v30, 0.0  ;;  %v788_v33 = vunpack.c.l.s4 %v1171_v32 }
 0x227   : >> { %v720_v36 = vmax.f32 %v703_v34, 0.0  ;;  %v706_v37 = vpop.f32.mrb[4].mxu1 }
 0x228   : >> { %v747_v39 = vmul.f32 %v733_v23, %v719_v35  ;;  %v707_v40 = vadd.f32 %v706_v37, %v602_v0  ;;  %v708_v41 = vpop.f32.mrb[5].mxu1 }
 0x229   : >> { %v748_v43 = vmul.f32 %v733_v23, %v720_v36  ;;  %v709_v44 = vadd.f32 %v708_v41, %v602_v0  ;;  %v778_v0 = vlaneseq  ;;  %v776_v36 = vpop.permute.xlu0 %775 }
 0x22a   : >> { %v753_v45 = vadd.f32 %v747_v39, %v745_v38  ;;  %v721_v46 = vmax.f32 %v707_v40, 0.0  ;;  %v789_v39 = vunpack.c.0.s8 %v788_v33 }
 0x22b   : >> { %v763_v48 = vadd.f32 %v748_v43, %v746_v42  ;;  %v722_v49 = vmax.f32 %v709_v44, 0.0  ;;  %v712_v50 = vpop.f32.mrb[6].mxu1  ;;  %v779_v29 = vshrl.u32 %v778_v0, 7  ;;  %vm807_vm5 = vcmp.lt.s32.totalorder %v778_v0, 256 }
 0x22c   : >> { %v749_v51 = vmul.f32 %v738_v47, %v721_v46  ;;  %v713_v52 = vadd.f32 %v712_v50, %v607_v26  ;;  %v714_v53 = vpop.f32.mrb[7].mxu1 }
 0x22d   : >> { %v750_v54 = vmul.f32 %v738_v47, %v722_v49  ;;  %v715_v55 = vadd.f32 %v714_v53, %v607_v26  ;;  %v780_v35 = vsub.s32 0, %v779_v29 }
 0x22e   : >> { %v754_v56 = vadd.f32 %v753_v45, %v749_v51  ;;  %v723_v57 = vmax.f32 %v713_v52, 0.0  ;;  %v792_v45 = vsub.s32 %v789_v39, %v779_v29 }
 0x22f   : >> { %v764_v59 = vadd.f32 %v763_v48, %v750_v54  ;;  %v724_v60 = vmax.f32 %v715_v55, 0.0  ;;  %v781_v41 = vrot.slane %v776_v36, %v780_v35 }
 0x230   : >> { %v751_v61 = vmul.f32 %v743_v58, %v723_v57 }
 0x231   : >> { %v752_v62 = vmul.f32 %v743_v58, %v724_v60 }
 0x232   : >> { %v755_v63 = vsel %vm621_vm2, %v751_v61, 0.0 }
 0x233   : >> { %v756_v22 = vadd.f32 %v755_v63, %v754_v56  ;;  %v765_v24 = vsel %vm621_vm2, %v752_v62, 0.0 }
 0x234   : >> { %v766_v25 = vadd.f32 %v765_v24, %v764_v59 }
 0x235   : >> { %v757_v27 = vrot.slane %v756_v22, 4 }
 0x236   : >> { %v767_v28 = vrot.slane %v766_v25, 4 }
 0x237   : >> { %v758_v30 = vadd.f32 %v757_v27, %v756_v22 }
 0x238   : >> { %v768_v31 = vadd.f32 %v767_v28, %v766_v25 }
 0x239   : >> { %v759_v26 = vrot.slane %v758_v30, 2 }
 0x23a   : >> { %v769_v34 = vrot.slane %v768_v31, 2 }
 0x23b   : >> { %v760_v23 = vadd.f32 %v759_v26, %v758_v30 }
 0x23c   : >> { %v770_v37 = vadd.f32 %v769_v34, %v768_v31 }
 0x23d   : >> { %v761_v38 = vrot.slane %v760_v23, 1 }
 0x23e   : >> { %v771_v40 = vrot.slane %v770_v37, 1 }
 0x23f   : >> { %v762_v42 = vadd.f32 %v761_v38, %v760_v23 }
 0x240   : >> { %v772_v43 = vadd.f32 %v771_v40, %v770_v37 }
 0x241   : >> { %v782_v44 = vadd.f32 %v781_v41, %v762_v42 }
 0x242   : >> { %v783_v46 = vadd.f32 %v781_v41, %v772_v43 }
 0x244   : >> { %v786_v47 = vcombine.low %v782_v44, %v783_v46  ;;  %327 = sbr.rel (!%p325_p11) target bundleno = 28 (0x1c), region = 92 }
 0x246   : >> { %v793_v48 = vrot.slane %v786_v47, %v792_v45 }
 0x248   : >> { %v800_v49 = vrot.slane %v793_v48, %v792_v45 }
 0x24a   : >> { %809 = vst.msk [vmem:[%s804_s10] sm:$0x3] %vm807_vm5, %v800_v49 }
 0x24b   : > { %1109 = shalt.err (!%p1106_p4)
}
 0x24c   : > { %s1110_s14 = scalar_lea.hbm %s1510_s18, 160  ;;  %s1114_s24 = scalar_lea.hbm %s1557_s7, 320 }
 0x24d   : > { %p1111_p7 = scmp.ne.s32.totalorder %s1510_s18, %s1110_s14  ;;  %p1115_p10 = scmp.lt.u32.totalorder %s1510_s18, %s1557_s7 }
 0x24e   : > { %p1116_p11 = scmp.lt.u32.totalorder %s1114_s24, %s1110_s14  ;;  %p1118_p13 = scmp.lt.u32.totalorder %s1110_s14, %s1510_s18 }
 0x24f   : > { %p1112_p8 = pnand %p1111_p7, %p1251_p5 }
 0x250   : > { %p1117_p12 = por %p1116_p11, %p1115_p10 }
 0x251   : > { %p1113_p9 = pneg %p1112_p8 }
 0x252   : > { %p1119_p0 = por %p1118_p13, %p1117_p12 }
 0x254   : > { %p1120_p1 = pnand %p1119_p0, %p1113_p9 }
 0x256   : > { %1123 = shalt.err (!%p1120_p1)
}
 0x257   : > { %1043 = dma.vmem_to_hbm [thread:$0]  (%p1251_p5), %s826_s19, 160, %s1510_s18, %s811_s20  }
 0x258 PF: > { %p1049_p2 = scmp.ge.s32.totalorder %s1162_s29, 2  ;;  %s837_s10 = sand.u32 1, %s1150_s26  }
 0x259   : > { %s838_s16 = scalar_lea.sflag [#allocation4], %s837_s10 }
 0x25a   : > { %p1046_p3 = pnand %p1049_p2, %p1255_p6 }
 0x25c   : > { %1145 = dma.done.wait (!%p1046_p3), %s838_s16, 160  }
 0x25d   : > { %1147 = vsyncadd (!%p1046_p3), %s838_s16, 4294967136  ;;  %p19_p4 = scmp.ge.s32.totalorder %s1239_s8, 4   ;;  %s1562_s26 = smov %s1154_s27 }
 0x25e   : > { %s1563_s27 = smov %s1158_s28  ;;  %s1564_s28 = smov %s1249_s11 }
 0x25f   : > { %s1565_s29 = smov %s1239_s8  ;;  %21 = sbr.rel (!%p19_p4) target bundleno = 6 (0x6), region = 103 }
 0x266   :  { %843 = vsyncpa [#allocation4], 1 }
 0x267   :  { %845 = vsyncpa [#allocation4 + $0x1], 1 }

</bundles_post_ra>
